<compile_context>
chip_gen: v7x
topology: tpu7x:2x2x1
jax: 0.10.0
libtpu: 0.0.40
codegen_flags: <defaults>
</compile_context>

<pallas_src>
import functools

import jax
import jax.numpy as jnp
from jax import lax
from jax.experimental import pallas as pl
from jax.experimental.pallas import tpu as pltpu


# --------------------------------------------------------------------------
# helpers
# --------------------------------------------------------------------------
def _round_up(v, m):
    return ((v + m - 1) // m) * m


_VMEM_LIMIT = 32 * 1024 * 1024  # explicit scoped-VMEM budget, safe on v5e/v6e/v7x


# --------------------------------------------------------------------------
# Pallas kernels: fused GEMM (shift + optional residual + activation epilogue)
# --------------------------------------------------------------------------
def _gemm_kernel(a_ref, b_ref, t_ref, o_ref, *, act):
    # single-pass deep-K GEMM; bf16 operands feed the MXU, accumulation in f32
    # stays in the (TM, TN) register tile (no VMEM spill of a big accumulator).
    y = jnp.dot(a_ref[...], b_ref[...], preferred_element_type=jnp.float32)
    y = y + t_ref[...]
    if act == "relu":
        y = jnp.maximum(y, 0.0)
    elif act == "sigmoid":
        y = jax.nn.sigmoid(y)
    o_ref[...] = y.astype(o_ref.dtype)


def _gemm_res_kernel(a_ref, b_ref, t_ref, r_ref, o_ref, *, act):
    # same, with the bottleneck residual add fused before the ReLU.
    y = jnp.dot(a_ref[...], b_ref[...], preferred_element_type=jnp.float32)
    y = y + t_ref[...] + r_ref[...].astype(jnp.float32)
    if act == "relu":
        y = jnp.maximum(y, 0.0)
    elif act == "sigmoid":
        y = jax.nn.sigmoid(y)
    o_ref[...] = y.astype(o_ref.dtype)


def _fused_gemm(A, W, shift, residual, act, out_dtype):
    """A:(M,K) @ W:(Kp,Np) prepacked bf16 (BN folded); fused shift/res/act."""
    M, K = A.shape
    Kp, Np = W.shape
    A = A.astype(jnp.bfloat16)
    if K < Kp:
        A = jnp.pad(A, ((0, 0), (0, Kp - K)))

    # TN=256 fills the 256-wide v6e/v7x MXU; fall back to 128 if Np or VMEM
    # budget does not allow it.
    TN = 256 if (Np % 256 == 0 and Np >= 256) else 128
    if TN == 256 and Kp * TN * 2 * 2 > 12 * 1024 * 1024:
        TN = 128

    if M <= 256:
        TM, Mp = M, M                      # single M block, no padding needed
    else:
        TM = 256
        while TM > 8 and Kp * TM * 2 * 2 > 12 * 1024 * 1024:
            TM //= 2                       # bound the double-buffered A block
        Mp = _round_up(M, TM)
        if Mp > M:
            A = jnp.pad(A, ((0, Mp - M), (0, 0)))

    in_specs = [pl.BlockSpec((TM, Kp), lambda i, j: (i, 0)),
                pl.BlockSpec((Kp, TN), lambda i, j: (0, j)),
                pl.BlockSpec((1, TN), lambda i, j: (0, j))]
    args = [A, W, shift]
    if residual is not None:
        res = residual.astype(jnp.bfloat16)
        rc = res.shape[1]
        if rc < Np or Mp > M:
            res = jnp.pad(res, ((0, Mp - M), (0, Np - rc)))
        in_specs.append(pl.BlockSpec((TM, TN), lambda i, j: (i, j)))
        args.append(res)
        kern = functools.partial(_gemm_res_kernel, act=act)
    else:
        kern = functools.partial(_gemm_kernel, act=act)

    out = pl.pallas_call(
        kern,
        out_shape=jax.ShapeDtypeStruct((Mp, Np), out_dtype),
        grid_spec=pltpu.PrefetchScalarGridSpec(
            num_scalar_prefetch=0,
            grid=(Mp // TM, Np // TN),
            in_specs=in_specs,
            out_specs=pl.BlockSpec((TM, TN), lambda i, j: (i, j))),
        compiler_params=pltpu.CompilerParams(
            dimension_semantics=("parallel", "parallel"),
            vmem_limit_bytes=_VMEM_LIMIT),
    )(*args)
    return out[:M] if Mp > M else out


@functools.partial(jax.jit, static_argnames=("act", "out_dtype"))
def pallas_gemm(A, W, shift, residual=None, *, act="none", out_dtype=jnp.bfloat16):
    return _fused_gemm(A, W, shift, residual, act, out_dtype)


@functools.partial(jax.jit,
                   static_argnames=("k", "dil", "pad", "stride", "taps", "act",
                                    "out_dtype"))
def pallas_conv_im2col(x, w, shift, *, k, dil, pad, stride, taps, act="none",
                       out_dtype=jnp.bfloat16):
    """Spatial conv = patch extraction (XLA, only at valid strided output
    positions, only alive taps) + one deep-K fused Pallas GEMM."""
    N, H, W_, C = x.shape
    oh = (H + 2 * pad - dil * (k - 1) - 1) // stride + 1
    ow = (W_ + 2 * pad - dil * (k - 1) - 1) // stride + 1
    xp = jnp.pad(x.astype(jnp.bfloat16), ((0, 0), (pad, pad), (pad, pad), (0, 0)))
    cols = []
    for dy, dx in taps:
        sl = lax.slice(xp,
                       (0, dy * dil, dx * dil, 0),
                       (N, dy * dil + (oh - 1) * stride + 1,
                        dx * dil + (ow - 1) * stride + 1, C),
                       (1, stride, stride, 1))
        cols.append(sl)
    A = jnp.concatenate(cols, axis=-1).reshape(N * oh * ow, len(taps) * C)
    return _fused_gemm(A, w, shift, None, act, out_dtype)


# --------------------------------------------------------------------------
# Conv dispatcher (host-side routing; all hot math runs in the fused GEMM)
# --------------------------------------------------------------------------
def _alive(kidx, size, osize, s, p, d):
    return any(0 <= o * s - p + kidx * d < size for o in range(osize))


def _collapsed_1x1_weight(cp):
    """Centre-tap-only 1x1 equivalent of a (possibly spatial) packed conv."""
    if cp["k"] == 1:
        return cp["w"], cp["kp"]
    if "w_1x1" not in cp:
        k, cin = cp["k"], cp["cin"]
        c = k // 2
        t = c * k + c
        w1 = cp["w"][t * cin:(t + 1) * cin]
        kp1 = _round_up(cin, 128)
        cp["w_1x1"] = jnp.pad(w1, ((0, kp1 - cin), (0, 0)))
        cp["kp_1x1"] = kp1
    return cp["w_1x1"], cp["kp_1x1"]


def conv2d(x, cp, *, act="none", residual=None, out_dtype=jnp.bfloat16,
           keep_padded=False):
    """x: NHWC activation (may carry zero-padded extra channels).
    cp: prepacked conv (bf16 weights, BN folded)."""
    k, d, p, s = cp["k"], cp["dil"], cp["pad"], cp["stride"]
    cin, cout, np_ = cp["cin"], cp["cout"], cp["np"]
    N, H, W_, C = x.shape
    oh = (H + 2 * p - d * (k - 1) - 1) // s + 1
    ow = (W_ + 2 * p - d * (k - 1) - 1) // s + 1

    taps = None
    k_eff = k
    if k > 1:
        taps = tuple((dy, dx) for dy in range(k) for dx in range(k)
                     if _alive(dy, H, oh, s, p, d) and _alive(dx, W_, ow, s, p, d))
        c = k // 2
        if taps == ((c, c),) and c * d == p:
            k_eff = 1          # every off-centre tap reads only zero padding

    if k_eff == 1:
        w1, kp1 = (cp["w"], cp["kp"]) if k == 1 else _collapsed_1x1_weight(cp)
        xs = x[:, ::s, ::s, :] if s != 1 else x
        M = N * oh * ow
        A = xs.reshape(M, C)
        if C != kp1 and C > cin:
            A = A[:, :cin]
        r2 = (residual.reshape(M, residual.shape[-1])
              if residual is not None else None)
        if M < 8:
            # batch-sized matrices (M == N): a kernel launch costs far more
            # than the math, keep it in plain XLA.
            Ab = A.astype(jnp.bfloat16)
            if Ab.shape[1] < kp1:
                Ab = jnp.pad(Ab, ((0, 0), (0, kp1 - Ab.shape[1])))
            y = jnp.dot(Ab, w1, preferred_element_type=jnp.float32) + cp["shift"]
            y = y[:, :cout]
            if r2 is not None:
                y = y + r2.astype(jnp.float32)
            if act == "relu":
                y = jnp.maximum(y, 0.0)
            elif act == "sigmoid":
                y = jax.nn.sigmoid(y)
            return y.astype(out_dtype).reshape(N, oh, ow, -1)
        out = pallas_gemm(A, w1, cp["shift"], r2, act=act, out_dtype=out_dtype)
        if not keep_padded and np_ > cout:
            out = out[:, :cout]
        return out.reshape(N, oh, ow, -1)

    # spatial path: alive-tap im2col + one fused GEMM
    assert residual is None
    key = ("w_taps", taps)
    if key not in cp:
        rows = [cp["w"][(dy * k + dx) * cin:(dy * k + dx) * cin + cin]
                for dy, dx in taps]
        wt = jnp.concatenate(rows, axis=0)
        kt = wt.shape[0]
        cp[key] = jnp.pad(wt, ((0, _round_up(kt, 128) - kt), (0, 0)))
    wt = cp[key]
    if C > cin:
        x = x[..., :cin]       # drop carried channel padding before im2col
    out = pallas_conv_im2col(x, wt, cp["shift"], k=k, dil=d, pad=p, stride=s,
                             taps=taps, act=act, out_dtype=out_dtype)
    if not keep_padded and np_ > cout:
        out = out[:, :cout]
    return out.reshape(N, oh, ow, -1)


# --------------------------------------------------------------------------
# Deterministic parameter construction (weights pre-packed for the kernels)
# --------------------------------------------------------------------------
_BASE_KEY = jax.random.PRNGKey(0)
_CTR = [0]


def _next_key():
    _CTR[0] += 1
    return jax.random.fold_in(_BASE_KEY, _CTR[0])


def pack_conv(cin, cout, k, *, stride=1, dil=1, pad=0, bias=False, bn=False):
    """Pre-pack a conv: (k*k*cin -> padded Kp, Np) bf16 weight in tap-major /
    channel-fastest order (matching the im2col patch layout), BN scale folded
    in, plus a (1, Np) f32 shift row."""
    fan_in = cin * k * k
    w = jax.random.normal(_next_key(), (cout, cin, k, k), jnp.float32)
    w = w * (2.0 / fan_in) ** 0.5
    if bn:
        gamma = jnp.ones((cout,), jnp.float32)
        beta = jnp.zeros((cout,), jnp.float32)
        mean = jnp.zeros((cout,), jnp.float32)
        var = jnp.ones((cout,), jnp.float32)
        scale = gamma / jnp.sqrt(var + 1e-5)
        shift = beta - mean * scale
    else:
        scale = jnp.ones((cout,), jnp.float32)
        shift = (0.01 * jax.random.normal(_next_key(), (cout,), jnp.float32)
                 if bias else jnp.zeros((cout,), jnp.float32))
    np_ = _round_up(cout, 128)
    K = k * k * cin
    kp = _round_up(K, 128)
    wt = jnp.transpose(w, (2, 3, 1, 0)) * scale[None, None, None, :]  # (k,k,cin,cout)
    wt = wt.reshape(K, cout)
    wt = jnp.pad(wt, ((0, kp - K), (0, np_ - cout))).astype(jnp.bfloat16)
    sh = jnp.pad(shift, (0, np_ - cout)).reshape(1, np_).astype(jnp.float32)
    return {"w": wt, "shift": sh, "k": k, "dil": dil, "pad": pad,
            "stride": stride, "cin": cin, "cout": cout, "kp": kp, "np": np_}


def att_p(c):
    return {"ch1": pack_conv(c, c, 1, bias=True),
            "sp1": pack_conv(c, 1, 3, pad=1, bias=True),
            "ch2": pack_conv(c, c, 1, bias=True),
            "sp2": pack_conv(c, 1, 3, pad=1, bias=True)}


def make_bottleneck(inplanes, planes, stride, rate):
    p = {"conv1": pack_conv(inplanes, planes, 1, bn=True),
         "conv2": pack_conv(planes, planes, 3, stride=stride, dil=rate,
                            pad=rate, bn=True),
         "conv3": pack_conv(planes, planes * 4, 1, bn=True)}
    if stride != 1 or inplanes != planes * 4:
        p["down"] = pack_conv(inplanes, planes * 4, 1, stride=stride, bn=True)
    return p


def make_layer(inplanes, planes, blocks, stride, rate):
    layers = [make_bottleneck(inplanes, planes, stride, rate)]
    for _ in range(1, blocks):
        layers.append(make_bottleneck(planes * 4, planes, 1, 1))
    return layers, planes * 4


def make_aspp(cin=2048, cout=256, rates=(1, 6, 12, 18)):
    mods = []
    for r in rates:
        kk = 1 if r == 1 else 3
        pd = 0 if r == 1 else r
        mods.append(pack_conv(cin, cout, kk, dil=r, pad=pd, bn=True))
    return {"mods": mods,
            "gap": pack_conv(cin, cout, 1, bn=True),
            "fuse": pack_conv(cout * 5, cout, 1, bn=True)}


def build_params(n_classes=1, os=16, n_in=3):
    assert os == 16
    strides, rates = (1, 2, 2, 1), (1, 1, 1, 2)

    def backbone():
        bp = {"conv1": pack_conv(n_in, 64, 7, stride=2, pad=3, bn=True)}
        inpl = 64
        bp["layer1"], inpl = make_layer(inpl, 64, 3, strides[0], rates[0])
        bp["layer2"], inpl = make_layer(inpl, 128, 4, strides[1], rates[1])
        bp["layer3"], inpl = make_layer(inpl, 256, 6, strides[2], rates[2])
        bp["layer4"], inpl = make_layer(inpl, 512, 3, strides[3], rates[3])
        return bp

    P = {"rgb": backbone(), "depth": backbone(),
         "att_conv1": att_p(64), "att_layer1": att_p(256),
         "att_layer2": att_p(512), "att_layer3": att_p(1024),
         "att_layer4": att_p(2048),
         "aspp_rgb": make_aspp(), "aspp_depth": make_aspp(),
         "dafm": {"conv_rgb": pack_conv(256, 256, 3, dil=3, pad=3, bn=True),
                  "conv_depth": pack_conv(256, 256, 3, dil=3, pad=3, bn=True),
                  "sa_rgb": pack_conv(256, 256, 1, bn=True),
                  "sa_depth": pack_conv(256, 256, 1, bn=True),
                  "conv3": pack_conv(256, 256, 3, dil=3, pad=3, bn=True),
                  "conv4": pack_conv(256, 256, 3, dil=3, pad=3, bn=True)},
         "bcfm": {"conv_rgb": pack_conv(256, 256, 1, bn=True),
                  "conv_depth": pack_conv(256, 256, 1, bn=True),
                  "sa_rgb": pack_conv(256, 256, 1, bn=True),
                  "sa_depth": pack_conv(256, 256, 1, bn=True)},
         "spm": {"rgb1": pack_conv(256, 256, 1, bias=True),
                 "rgb2": pack_conv(256, 256, 1, bias=True),
                 "rgb3": pack_conv(256, 256, 1, bias=True),
                 "d1": pack_conv(256, 256, 1, bias=True),
                 "d2": pack_conv(256, 256, 1, bias=True),
                 "d3": pack_conv(256, 256, 1, bias=True),
                 "con": pack_conv(768, 256, 1, bias=True)},  # SPM.fusion unused
         "last": {"c1": pack_conv(256, 256, 3, pad=1, bn=True),
                  "c2": pack_conv(256, 256, 3, pad=1, bn=True),
                  "c3": pack_conv(256, n_classes, 1, bias=True)}}
    return P


# --------------------------------------------------------------------------
# Module forward functions (glue in XLA; conv/BN/act hot path in Pallas)
# --------------------------------------------------------------------------
def maxpool_3x3_s2(x):
    # TODO(synk): Pallas max-pool kernel; lax.reduce_window is not a hot path.
    return lax.reduce_window(x, jnp.asarray(-jnp.inf, x.dtype), lax.max,
                             window_dimensions=(1, 3, 3, 1),
                             window_strides=(1, 2, 2, 1),
                             padding=((0, 0), (1, 1), (1, 1), (0, 0)))


def bottleneck(x, p):
    # keep_padded: intermediate activations keep their zero channel padding so
    # the next conv consumes them without a slice/re-pad round trip.
    out = conv2d(x, p["conv1"], act="relu", keep_padded=True)
    out = conv2d(out, p["conv2"], act="relu", keep_padded=True)
    residual = conv2d(x, p["down"], act="none") if "down" in p else x
    # residual add + final ReLU are fused into the conv3 GEMM epilogue
    return conv2d(out, p["conv3"], act="relu", residual=residual)


def run_layer(x, layer_params):
    for p in layer_params:
        x = bottleneck(x, p)
    return x


def bi_attention(img_feat, depth_feat, p):
    img_att = conv2d(img_feat, p["sp1"], act="sigmoid")
    depth_att = conv2d(depth_feat, p["sp2"], act="sigmoid")
    # NOTE: matches the PyTorch reference exactly (depth_att uses the already
    # updated img_att).
    img_att = img_att + img_att * depth_att
    depth_att = depth_att + img_att * depth_att
    sa_img = depth_att * img_feat
    sa_depth = img_att * depth_feat

    def channel(feat, convp):
        vec = jnp.mean(feat.astype(jnp.float32), axis=(1, 2), keepdims=True)
        vec = conv2d(vec, convp, act="none", out_dtype=jnp.float32)
        vec = jax.nn.softmax(vec, axis=-1) * vec.shape[-1]
        return feat * vec.astype(feat.dtype)

    return channel(sa_img, p["ch1"]), channel(sa_depth, p["ch2"])


def _branch_collapses(m, H, W_):
    k, d, p = m["k"], m["dil"], m["pad"]
    if k == 1:
        return True
    oh = H + 2 * p - d * (k - 1)
    ow = W_ + 2 * p - d * (k - 1)
    taps = [(dy, dx) for dy in range(k) for dx in range(k)
            if _alive(dy, H, oh, 1, p, d) and _alive(dx, W_, ow, 1, p, d)]
    c = k // 2
    return taps == [(c, c)] and c * d == p


def aspp_forward(x, p):
    N, H, W_, _ = x.shape
    if all(_branch_collapses(m, H, W_) for m in p["mods"]):
        # every dilated branch reduces exactly to its centre tap at this
        # resolution -> fuse all four branch GEMMs into one (weights concat
        # along N), built once and cached.
        if "fused_1x1" not in p:
            ws, shs = [], []
            for m in p["mods"]:
                w1, _ = _collapsed_1x1_weight(m)
                ws.append(w1)
                shs.append(m["shift"])
            wf = jnp.concatenate(ws, axis=1)
            sf = jnp.concatenate(shs, axis=1)
            cf = sum(m["np"] for m in p["mods"])
            p["fused_1x1"] = {"w": wf, "shift": sf, "k": 1, "dil": 1, "pad": 0,
                              "stride": 1, "cin": p["mods"][0]["cin"],
                              "cout": cf, "kp": wf.shape[0], "np": cf}
        branch = conv2d(x, p["fused_1x1"], act="relu")
    else:
        branch = jnp.concatenate([conv2d(x, m, act="relu") for m in p["mods"]],
                                 axis=-1)
    gap = jnp.mean(x.astype(jnp.float32), axis=(1, 2), keepdims=True)
    gap = conv2d(gap, p["gap"], act="relu")
    gap = jnp.broadcast_to(gap.astype(branch.dtype),
                           (N, H, W_, gap.shape[-1]))  # bilinear from 1x1 = const
    cat = jnp.concatenate([branch, gap], axis=-1)
    return conv2d(cat, p["fuse"], act="relu")


def dafm_forward(rgb, depth, p):
    Fr = conv2d(rgb, p["conv_rgb"], act="relu")
    Fd = conv2d(depth, p["conv_depth"], act="relu")

    def sa(feat, pp):
        v = jnp.mean(feat.astype(jnp.float32), axis=(1, 2), keepdims=True)
        return conv2d(v, pp, act="relu")

    Fr = sa(Fr, p["sa_rgb"])
    Fd = sa(Fd, p["sa_depth"])
    fusion_r = conv2d(Fr, p["conv3"], act="relu")            # MaxPool2d(1)+ReLU = id
    fusion_d = jax.nn.sigmoid(conv2d(Fd, p["conv4"], act="relu"))
    weight_rgb = fusion_r[..., 0:1]
    weight_depth = fusion_d[..., 1:2]
    Fr_out = rgb * fusion_r
    Fd_out = depth * fusion_d
    t = Fr_out * weight_rgb * Fd_out * weight_depth
    return t + t


def bcfm_forward(rgb, depth, p):
    Fr = rgb * conv2d(rgb, p["conv_rgb"], act="relu")
    Fd = depth * conv2d(depth, p["conv_depth"], act="relu")

    def sa(feat, pp):
        v = jnp.mean(feat.astype(jnp.float32), axis=(1, 2), keepdims=True)
        return conv2d(v, pp, act="relu")

    return jax.nn.sigmoid(sa(Fr, p["sa_rgb"])), jax.nn.sigmoid(sa(Fd, p["sa_depth"]))


def spm_forward(rgb, depth, p):
    fr1 = conv2d(rgb, p["rgb1"], act="relu")
    fr2 = fr1 + conv2d(fr1, p["rgb2"], act="relu")
    fr3 = fr2 + conv2d(fr2, p["rgb3"], act="relu")
    fd1 = conv2d(depth, p["d1"], act="relu")
    fd2 = conv2d(fd1, p["d2"], act="relu")
    fd3 = conv2d(fd2, p["d3"], act="relu")
    fuse1 = jnp.concatenate([fr1, fr2, fr3], axis=-1)
    fuse2 = jnp.concatenate([fd1, fd2, fd3], axis=-1)
    return conv2d(fuse1 + fuse2, p["con"], act="sigmoid")


def last_conv_forward(x, p):
    x = conv2d(x, p["c1"], act="relu")
    x = conv2d(x, p["c2"], act="relu")
    return conv2d(x, p["c3"], act="none", out_dtype=jnp.float32)


def upsample256_from_1x1(x):
    # bilinear, align_corners=True, scale_factor=256 on a 1x1 map is constant.
    N, H, W, C = x.shape
    assert H == 1 and W == 1
    return jnp.broadcast_to(x, (N, 256, 256, C))


def dscnet_forward(img_nchw, depth_nchw, P):
    x = jnp.transpose(img_nchw, (0, 2, 3, 1))    # NCHW -> NHWC
    y = jnp.transpose(depth_nchw, (0, 2, 3, 1))

    x = conv2d(x, P["rgb"]["conv1"], act="relu")
    y = conv2d(y, P["depth"]["conv1"], act="relu")
    x, y = bi_attention(x, y, P["att_conv1"])

    x = maxpool_3x3_s2(x)
    x = run_layer(x, P["rgb"]["layer1"])
    y = maxpool_3x3_s2(y)
    y = run_layer(y, P["depth"]["layer1"])
    x, y = bi_attention(x, y, P["att_layer1"])

    x = run_layer(x, P["rgb"]["layer2"])
    y = run_layer(y, P["depth"]["layer2"])
    x, y = bi_attention(x, y, P["att_layer2"])

    x = run_layer(x, P["rgb"]["layer3"])
    y = run_layer(y, P["depth"]["layer3"])
    x, y = bi_attention(x, y, P["att_layer3"])

    x = run_layer(x, P["rgb"]["layer4"])
    y = run_layer(y, P["depth"]["layer4"])
    x, y = bi_attention(x, y, P["att_layer4"])

    x = aspp_forward(x, P["aspp_rgb"])
    y = aspp_forward(y, P["aspp_depth"])

    x = dafm_forward(x, y, P["dafm"])
    x, y = bcfm_forward(x, y, P["bcfm"])          # (N,1,1,256) each
    sal = spm_forward(x, y, P["spm"])

    # the three heads share the last_conv weights: one pass over a batch-stack
    stacked = jnp.concatenate([sal, x, y], axis=0)        # (3N,1,1,256)
    heads = last_conv_forward(stacked, P["last"])         # (3N,1,1,n_classes)
    sal, sal_rgb, sal_depth = jnp.split(heads, 3, axis=0)

    sal = upsample256_from_1x1(sal)
    sal_rgb = upsample256_from_1x1(sal_rgb)
    sal_depth = upsample256_from_1x1(sal_depth)

    to_nchw = lambda z: jnp.transpose(z, (0, 3, 1, 2))
    return to_nchw(sal), to_nchw(sal_rgb), to_nchw(sal_depth)


# --------------------------------------------------------------------------
if __name__ == "__main__":
    n_classes = 1
    P = build_params(n_classes=n_classes, os=16, n_in=3)

    key = jax.random.PRNGKey(0)
    k1, k2 = jax.random.split(key)
    img = jax.random.normal(k1, (2, 3, 32, 32), jnp.float32)
    depth = jax.random.normal(k2, (2, 3, 32, 32), jnp.float32)

    sal, sal_rgb, sal_depth = dscnet_forward(img, depth, P)
    jax.block_until_ready((sal, sal_rgb, sal_depth))

    assert sal.shape == (2, n_classes, 256, 256)
    assert sal_rgb.shape == (2, n_classes, 256, 256)
    assert sal_depth.shape == (2, n_classes, 256, 256)
    print("KERNEL_OK")
</pallas_src>

<mosaic_0001>
module attributes {stable_mosaic.version = 11 : i64} {
  func.func @_gemm_kernel(%arg0: i32, %arg1: i32, %arg2: memref<256x256xbf16, #tpu.memory_space<vmem>>, %arg3: memref<256x128xbf16, #tpu.memory_space<vmem>>, %arg4: memref<1x128xf32, #tpu.memory_space<vmem>>, %arg5: memref<256x128xbf16, #tpu.memory_space<vmem>>) attributes {dimension_semantics = [#tpu.dimension_semantics<parallel>, #tpu.dimension_semantics<parallel>], iteration_bounds = array<i64: 2, 1>, scalar_prefetch = 0 : i64, scratch_operands = 0 : i64, tpu.core_type = #tpu.core_type<tc>, window_params = [{transform_indices = @transform_0, window_bounds = array<i64: 256, 256>}, {transform_indices = @transform_1, window_bounds = array<i64: 256, 128>}, {transform_indices = @transform_2, window_bounds = array<i64: 1, 128>}, {transform_indices = @transform_3, window_bounds = array<i64: 256, 128>}]} {
    %c0 = arith.constant 0 : index
    %c0_0 = arith.constant 0 : index
    %0 = vector.load %arg2[%c0, %c0_0] : memref<256x256xbf16, #tpu.memory_space<vmem>>, vector<256x256xbf16>
    %c0_1 = arith.constant 0 : index
    %c0_2 = arith.constant 0 : index
    %1 = vector.load %arg3[%c0_1, %c0_2] : memref<256x128xbf16, #tpu.memory_space<vmem>>, vector<256x128xbf16>
    %cst = arith.constant dense<0.000000e+00> : vector<256x128xf32>
    %2 = tpu.matmul %0, %1, %cst {dimension_numbers = #tpu.dot_dimension_numbers<[1], [0], [0], [1], [0, 0, 1, 1], [], []>} : vector<256x256xbf16>, vector<256x128xbf16>, vector<256x128xf32> -> vector<256x128xf32>
    %c0_3 = arith.constant 0 : index
    %c0_4 = arith.constant 0 : index
    %3 = vector.load %arg4[%c0_3, %c0_4] : memref<1x128xf32, #tpu.memory_space<vmem>>, vector<1x128xf32>
    %4 = vector.broadcast %3 : vector<1x128xf32> to vector<256x128xf32>
    %5 = arith.addf %2, %4 : vector<256x128xf32>
    %cst_5 = arith.constant 0.000000e+00 : f32
    %6 = vector.broadcast %cst_5 : f32 to vector<256x128xf32>
    %7 = arith.maximumf %5, %6 : vector<256x128xf32>
    %8 = arith.truncf %7 : vector<256x128xf32> to vector<256x128xbf16>
    %c0_6 = arith.constant 0 : index
    %c0_7 = arith.constant 0 : index
    %9 = vector.load %arg5[%c0_6, %c0_7] : memref<256x128xbf16, #tpu.memory_space<vmem>>, vector<256x128xbf16>
    tpu.vector_store %arg5[%c0_6, %c0_7], %8 {strides = array<i32>} : memref<256x128xbf16, #tpu.memory_space<vmem>>, vector<256x128xbf16>,
    return
  }
  func.func @transform_0(%arg0: i32, %arg1: i32) -> (i32, i32) {
    %c0_i32 = arith.constant 0 : i32
    %c0_i32_0 = arith.constant 0 : i32
    return %arg0, %c0_i32 : i32, i32
  }
  func.func @transform_1(%arg0: i32, %arg1: i32) -> (i32, i32) {
    %c0_i32 = arith.constant 0 : i32
    %c0_i32_0 = arith.constant 0 : i32
    return %c0_i32, %arg1 : i32, i32
  }
  func.func @transform_2(%arg0: i32, %arg1: i32) -> (i32, i32) {
    %c0_i32 = arith.constant 0 : i32
    %c0_i32_0 = arith.constant 0 : i32
    return %c0_i32, %arg1 : i32, i32
  }
  func.func @transform_3(%arg0: i32, %arg1: i32) -> (i32, i32) {
    %c0_i32 = arith.constant 0 : i32
    return %arg0, %arg1 : i32, i32
  }
}

</mosaic_0001>

<bundles_post_ra>
// kernel: pallas_conv_im2col.1
= control target key start
LH: loop header
LB: loop body
LE: loop exit
PB: predicated region body
PF: predicated region fallthrough
CT: control target
= control target key end

     0   :  { %8 = vsyncpa [#allocation3], 0  ;;  %s1849_s0 = inlined_call_operand.vmem [shape: bf16[512,256], index: 0, kind: input, shape index: {}]   ;;  %s1850_s1 = inlined_call_operand.vmem [shape: bf16[256,128], index: 1, kind: input, shape index: {}]   ;;  %s1851_s2 = inlined_call_operand.vmem [shape: f32[1,128], index: 2, kind: input, shape index: {}]   ;;  %s1852_s3 = inlined_call_operand.hbm [shape: bf16[512,128], index: 3, kind: output, shape index: {}]  }
   0x1   :  { %10 = vsyncpa [#allocation3 + $0x1], 0  ;;  %s1593_s12 = smov 0   ;;  %s1595_s13 = smov 0  }
   0x2   :  { %s1597_s14 = smov 0   ;;  %s1599_s15 = smov 0  }
   0x3   :  { %s1601_s16 = smov 0   ;;  %s1603_s17 = smov 0  }
   0x4 LB: > { %s1015_s18 = sadd.s32 4294967295, %s1568_s17   ;;  %s1016_s19 = sadd.s32 4294967294, %s1568_s17   ;;  %s1568_s17 = sphi %s1603_s17, %s16_s17   ;;  %s1564_s16 = sphi %s1601_s16, %s1859_s16   ;;  %s1560_s15 = sphi %s1599_s15, %s1858_s15   ;;  %s1556_s14 = sphi %s1597_s14, %s1857_s14   ;;  %s1552_s13 = sphi %s1595_s13, %s1856_s13   ;;  %s1548_s12 = sphi %s1593_s12, %s1855_s12  }
   0x5   : > { %s28_s20 = sadd.s32 1, %s1564_s16  ;;  %s115_s21 = sadd.s32 1, %s1556_s14 }
   0x6   : > { %p30_p0 = scmp.ge.s32.totalorder %s28_s20, 2  ;;  %p125_p1 = scmp.ne.s32.totalorder %s1556_s14, %s1552_s13 }
   0x7   : > { %p126_p2 = scmp.eq.s32.totalorder %s1015_s18, 1  ;;  %p131_p3 = scmp.ne.s32.totalorder %s1552_s13, %s1548_s12 }
   0x8   : > { %s1861_s20 = smov (%p30_p0, %s28_s20), 0  ;;  %p132_p5 = scmp.eq.s32.totalorder %s1016_s19, 1 }
   0x9   : > { %p1633_p4 = por %p126_p2, %p125_p1  ;;  %s110_s23 = ssub.s32 %s1564_s16, %s1861_s20 }
   0xa   : > { %p1021_p6 = scmp.ge.s32.totalorder %s1568_s17, 1  ;;  %p113_p7 = scmp.eq.s32.totalorder %s110_s23, 0 }
   0xb   : > { %p1640_p8 = por %p132_p5, %p131_p3  ;;  %p173_p9 = scmp.lt.s32.totalorder %s1568_s17, 3 }
   0xc   : > { %s1646_s25 = scalar_select %p113_p7, %s1556_s14, %s115_s21  }
   0xd   : > { %p174_p10 = pnand %p1021_p6, %p173_p9 }
   0xe   : > { %v1426_v0 = vld [vmem:[%s1850_s1 + $0x40] sm:$0xff] (!%p174_p10)   ;;  %s1023_s28 = sshll.u32 (!%p174_p10), %s1560_s15, 5  ;;  %v1428_v2 = vld [vmem:[%s1850_s1 + $0x48] sm:$0xff] (!%p174_p10)   ;;  %v1430_v4 = vld [vmem:[%s1850_s1 + $0x50] sm:$0xff] (!%p174_p10)   ;;  %s202_s6 = sand.u32 (!%p174_p10), 1, %s1552_s13  }
   0xf   : > { %177 = sbr.rel (%p174_p10) target bundleno = 342 (0x156), region = 32  ;;  %v1427_v1 = vld [vmem:[%s1850_s1] sm:$0xff] (!%p174_p10)   ;;  %1241 = vmatprep.subr.bf16.mxu0 (!%p174_p10), %v1426_v0  ;;  %1353 = vmatprep.subr.bf16.mxu1 (!%p174_p10), %v1426_v0  ;;  %v1429_v3 = vld [vmem:[%s1850_s1 + $0x8] sm:$0xff] (!%p174_p10)   ;;  %p206_p11 = scmp.lt.s32.totalorder (!%p174_p10), %s1023_s28, 63  ;;  %v1431_v5 = vld [vmem:[%s1850_s1 + $0x10] sm:$0xff] (!%p174_p10)  }
  0x10   : > { %1242 = vmatpush3.bf16.msra.mxu0 (!%p174_p10), %v1427_v1  ;;  %1361 = vmatpush3.bf16.msra.mxu1 (!%p174_p10), %v1427_v1  ;;  %v1432_v6 = vld [vmem:[%s1850_s1 + $0x58] sm:$0xff] (!%p174_p10)   ;;  %v1434_v8 = vld [vmem:[%s1850_s1 + $0x60] sm:$0xff] (!%p174_p10)   ;;  %v1436_v10 = vld [vmem:[%s1850_s1 + $0x68] sm:$0xff] (!%p174_p10)   ;;  %s1570_s19 = smov (!%p174_p10), [#allocation2]  }
  0x11   : > { %1243 = vmatprep.subr.bf16.mxu0 (!%p174_p10), %v1428_v2  ;;  %1354 = vmatprep.subr.bf16.mxu1 (!%p174_p10), %v1428_v2  ;;  %v1433_v7 = vld [vmem:[%s1850_s1 + $0x18] sm:$0xff] (!%p174_p10)   ;;  %v1435_v9 = vld [vmem:[%s1850_s1 + $0x20] sm:$0xff] (!%p174_p10)   ;;  %v1437_v13 = vld [vmem:[%s1850_s1 + $0x28] sm:$0xff] (!%p174_p10)   ;;  %s1494_s21 = sshll.u32 (!%p174_p10), %s1570_s19, 4  ;;  %s1495_s21 = int_to_ptr.vmem [resolvable:$false] %s1494_s21 }
  0x12   : > { %v1438_v14 = vld [vmem:[%s1850_s1 + $0x70] sm:$0xff] (!%p174_p10)   ;;  %v1440_v16 = vld [vmem:[%s1850_s1 + $0x78] sm:$0xff] (!%p174_p10)   ;;  %v1737_v50 = vld [vmem:[%s1851_s2] ss:$0 sm:$0xff] (!%p174_p10)  ;;  %s1496_s23 = scalar_lea.vmem (!%p174_p10), %s1495_s21, 4096 }
  0x13   : > { %v1439_v15 = vld [vmem:[%s1850_s1 + $0x30] sm:$0xff] (!%p174_p10)   ;;  %v1441_v17 = vld [vmem:[%s1850_s1 + $0x38] sm:$0xff] (!%p174_p10)  }
  0x14   : > { %1244 = vmatpush3.bf16.msra.mxu0 (!%p174_p10), %v1429_v3  ;;  %1362 = vmatpush3.bf16.msra.mxu1 (!%p174_p10), %v1429_v3 }
  0x15   : > { %1245 = vmatprep.subr.bf16.mxu0 (!%p174_p10), %v1430_v4  ;;  %1355 = vmatprep.subr.bf16.mxu1 (!%p174_p10), %v1430_v4 }
  0x16   : > { %s1863_s28 = smov (!%p206_p11, %s1023_s28), 63 }
  0x17   : > { %s1112_s26 = sshll.u32 %s1863_s28, 3  ;;  %s1145_s28 = sshll.u32 %s1560_s15, 11 }
  0x18   : > { %1246 = vmatpush3.bf16.msra.mxu0 %v1431_v5  ;;  %1363 = vmatpush3.bf16.msra.mxu1 %v1431_v5  ;;  %s1679_s5 = scalar_lea.vmem %s1849_s0, %s1112_s26  ;;  %s1795_s11 = scalar_lea.hbm %s1852_s3, %s1145_s28 }
  0x19   : > { %1247 = vmatprep.subr.bf16.mxu0 %v1432_v6  ;;  %1356 = vmatprep.subr.bf16.mxu1 %v1432_v6  ;;  %v1444_v11 = vld [vmem:[%s1679_s5 + $0x4] ss:$8 sps:$4 sm:$0xff]   ;;  %v1442_v18 = vld [vmem:[%s1679_s5] ss:$8 sps:$4 sm:$0xff]   ;;  %v1448_v20 = vld [vmem:[%s1679_s5 + $0x14] ss:$8 sps:$4 sm:$0xff]  }
  0x1a   : > { %v1447_v12 = vld [vmem:[%s1679_s5 + $0x84] ss:$8 sps:$4 sm:$0xff]   ;;  %580 = vmatprep.mubr.bf16.mxu0 %v1444_v11  ;;  %v1445_v19 = vld [vmem:[%s1679_s5 + $0x80] ss:$8 sps:$4 sm:$0xff]   ;;  %v1450_v21 = vld [vmem:[%s1679_s5 + $0x94] ss:$8 sps:$4 sm:$0xff]  }
  0x1b   : > { %644 = vmatprep.mubr.bf16.mxu1 %v1447_v12  ;;  %v1452_v22 = vld [vmem:[%s1679_s5 + $0x10] ss:$8 sps:$4 sm:$0xff]   ;;  %v1454_v24 = vld [vmem:[%s1679_s5 + $0x24] ss:$8 sps:$4 sm:$0xff]   ;;  %v1458_v26 = vld [vmem:[%s1679_s5 + $0x20] ss:$8 sps:$4 sm:$0xff]  }
  0x1c   : > { %1248 = vmatpush3.bf16.msra.mxu0 %v1433_v7  ;;  %1364 = vmatpush3.bf16.msra.mxu1 %v1433_v7  ;;  %v1453_v23 = vld [vmem:[%s1679_s5 + $0x90] ss:$8 sps:$4 sm:$0xff]   ;;  %v1456_v25 = vld [vmem:[%s1679_s5 + $0xa4] ss:$8 sps:$4 sm:$0xff]   ;;  %v1459_v27 = vld [vmem:[%s1679_s5 + $0xa0] ss:$8 sps:$4 sm:$0xff]  }
  0x1d   : > { %1249 = vmatprep.subr.bf16.mxu0 %v1434_v8  ;;  %1357 = vmatprep.subr.bf16.mxu1 %v1434_v8  ;;  %v1460_v28 = vld [vmem:[%s1679_s5 + $0x34] ss:$8 sps:$4 sm:$0xff]   ;;  %v1464_v30 = vld [vmem:[%s1679_s5 + $0x30] ss:$8 sps:$4 sm:$0xff]   ;;  %v1466_v32 = vld [vmem:[%s1679_s5 + $0x44] ss:$8 sps:$4 sm:$0xff]  }
  0x1e   : > { %v1462_v29 = vld [vmem:[%s1679_s5 + $0xb4] ss:$8 sps:$4 sm:$0xff]   ;;  %v1465_v31 = vld [vmem:[%s1679_s5 + $0xb0] ss:$8 sps:$4 sm:$0xff]   ;;  %v1468_v33 = vld [vmem:[%s1679_s5 + $0xc4] ss:$8 sps:$4 sm:$0xff]  }
  0x1f   : > { %v1470_v34 = vld [vmem:[%s1679_s5 + $0x40] ss:$8 sps:$4 sm:$0xff]   ;;  %v1472_v36 = vld [vmem:[%s1679_s5 + $0x54] ss:$8 sps:$4 sm:$0xff]   ;;  %v1476_v38 = vld [vmem:[%s1679_s5 + $0x50] ss:$8 sps:$4 sm:$0xff]  }
  0x20   : > { %1250 = vmatpush3.bf16.msra.mxu0 %v1435_v9  ;;  %1365 = vmatpush3.bf16.msra.mxu1 %v1435_v9  ;;  %v1471_v35 = vld [vmem:[%s1679_s5 + $0xc0] ss:$8 sps:$4 sm:$0xff]   ;;  %v1474_v37 = vld [vmem:[%s1679_s5 + $0xd4] ss:$8 sps:$4 sm:$0xff]   ;;  %v1477_v39 = vld [vmem:[%s1679_s5 + $0xd0] ss:$8 sps:$4 sm:$0xff]  }
  0x21   : > { %1251 = vmatprep.subr.bf16.mxu0 %v1436_v10  ;;  %1358 = vmatprep.subr.bf16.mxu1 %v1436_v10  ;;  %v1478_v40 = vld [vmem:[%s1679_s5 + $0x64] ss:$8 sps:$4 sm:$0xff]   ;;  %v1482_v42 = vld [vmem:[%s1679_s5 + $0x60] ss:$8 sps:$4 sm:$0xff]   ;;  %v1484_v44 = vld [vmem:[%s1679_s5 + $0x74] ss:$8 sps:$4 sm:$0xff]  }
  0x22   : > { %v1480_v41 = vld [vmem:[%s1679_s5 + $0xe4] ss:$8 sps:$4 sm:$0xff]   ;;  %v1483_v43 = vld [vmem:[%s1679_s5 + $0xe0] ss:$8 sps:$4 sm:$0xff]   ;;  %v1486_v45 = vld [vmem:[%s1679_s5 + $0xf4] ss:$8 sps:$4 sm:$0xff]  }
  0x23   : > { %v1488_v46 = vld [vmem:[%s1679_s5 + $0x70] ss:$8 sps:$4 sm:$0xff]   ;;  %s1803_s15 = scalar_lea.sflag [#allocation3], %s202_s6 }
  0x24   : > { %1252 = vmatpush3.bf16.msra.mxu0 %v1437_v13  ;;  %1366 = vmatpush3.bf16.msra.mxu1 %v1437_v13  ;;  %v1489_v47 = vld [vmem:[%s1679_s5 + $0xf0] ss:$8 sps:$4 sm:$0xff]   ;;  %s1022_s5 = sshll.u32 %s202_s6, 7 }
  0x25   : > { %1253 = vmatprep.subr.bf16.mxu0 %v1438_v14  ;;  %1359 = vmatprep.subr.bf16.mxu1 %v1438_v14  ;;  %s1746_s7 = scalar_lea.vmem [#allocation2], %s1022_s5 }
  0x26   : > { %s916_s8 = sshll.u32 %s1746_s7, 4  ;;  %s1797_s8 = int_to_ptr.vmem [resolvable:$true] %s916_s8 }
  0x27   : > { %s1490_s18 = scalar_lea.vmem %s1797_s8, 2048  ;;  %p1497_p1 = scmp.lt.s32.totalorder %s1797_s8, %s1495_s21 }
  0x28   : > { %1254 = vmatpush3.bf16.msra.mxu0 %v1439_v15  ;;  %1367 = vmatpush3.bf16.msra.mxu1 %v1439_v15  ;;  %p1491_p12 = scmp.ne.s32.totalorder %s1797_s8, %s1490_s18  ;;  %p1498_p2 = scmp.lt.s32.totalorder %s1496_s23, %s1490_s18 }
  0x29   : > { %1255 = vmatprep.subr.bf16.mxu0 %v1440_v16  ;;  %1360 = vmatprep.subr.bf16.mxu1 %v1440_v16 }
  0x2a   : > { %p1492_p13 = pnand %p1491_p12, %p1633_p4  ;;  %p1499_p3 = por %p1498_p2, %p1497_p1 }
  0x2c   : > { %1256 = vmatpush3.bf16.msra.mxu0 %v1441_v17  ;;  %1368 = vmatpush3.bf16.msra.mxu1 %v1441_v17  ;;  %p1493_p0 = pneg %p1492_p13 }
  0x2e   : > { %p1500_p5 = pnand %p1499_p3, %p1493_p0 }
  0x2f   : > { %581 = vmatmul.mubr.bf16.vlgmr.msra.gmra.mrb[0].mxu0 %v1442_v18  ;;  %645 = vmatmul.mubr.bf16.vlgmr.msra.gmra.mrb[0].mxu1 %v1445_v19 }
  0x30   : > { %588 = vmatprep.mubr.bf16.mxu0 %v1448_v20  ;;  %652 = vmatprep.mubr.bf16.mxu1 %v1450_v21 }
  0x37   : > { %589 = vmatmul.mubr.bf16.gmra.mrb[4].mxu0 %v1452_v22  ;;  %653 = vmatmul.mubr.bf16.gmra.mrb[4].mxu1 %v1453_v23 }
  0x38   : > { %596 = vmatprep.mubr.bf16.mxu0 %v1454_v24  ;;  %660 = vmatprep.mubr.bf16.mxu1 %v1456_v25 }
  0x3f   : > { %597 = vmatmul.mubr.bf16.gmra.mrb[8].mxu0 %v1458_v26  ;;  %661 = vmatmul.mubr.bf16.gmra.mrb[8].mxu1 %v1459_v27 }
  0x40   : > { %604 = vmatprep.mubr.bf16.mxu0 %v1460_v28  ;;  %668 = vmatprep.mubr.bf16.mxu1 %v1462_v29 }
  0x47   : > { %605 = vmatmul.mubr.bf16.gmra.mrb[12].mxu0 %v1464_v30  ;;  %669 = vmatmul.mubr.bf16.gmra.mrb[12].mxu1 %v1465_v31 }
  0x48   : > { %612 = vmatprep.mubr.bf16.mxu0 %v1466_v32  ;;  %676 = vmatprep.mubr.bf16.mxu1 %v1468_v33 }
  0x4f   : > { %613 = vmatmul.mubr.bf16.gmra.mrb[16].mxu0 %v1470_v34  ;;  %677 = vmatmul.mubr.bf16.gmra.mrb[16].mxu1 %v1471_v35 }
  0x50   : > { %620 = vmatprep.mubr.bf16.mxu0 %v1472_v36  ;;  %684 = vmatprep.mubr.bf16.mxu1 %v1474_v37 }
  0x57   : > { %621 = vmatmul.mubr.bf16.gmra.mrb[20].mxu0 %v1476_v38  ;;  %685 = vmatmul.mubr.bf16.gmra.mrb[20].mxu1 %v1477_v39 }
  0x58   : > { %628 = vmatprep.mubr.bf16.mxu0 %v1478_v40  ;;  %692 = vmatprep.mubr.bf16.mxu1 %v1480_v41 }
  0x5f   : > { %629 = vmatmul.mubr.bf16.gmra.mrb[24].mxu0 %v1482_v42  ;;  %693 = vmatmul.mubr.bf16.gmra.mrb[24].mxu1 %v1483_v43 }
  0x60   : > { %636 = vmatprep.mubr.bf16.mxu0 %v1484_v44  ;;  %700 = vmatprep.mubr.bf16.mxu1 %v1486_v45 }
  0x67   : > { %637 = vmatmul.mubr.bf16.gmra.mrb[28].mxu0 %v1488_v46  ;;  %701 = vmatmul.mubr.bf16.gmra.mrb[28].mxu1 %v1489_v47 }
 0x102   : > { %v1257_v48 = vpop.f32.mrb[0].mxu0  ;;  %v1305_v49 = vpop.f32.mrb[0].mxu1 }
 0x103   : > { %v1258_v51 = vpop.f32.mrb[1].mxu0  ;;  %v1306_v52 = vpop.f32.mrb[1].mxu1 }
 0x104   : > { %v1259_v53 = vadd.f32 %v1258_v51, %v1257_v48  ;;  %v1307_v54 = vadd.f32 %v1306_v52, %v1305_v49  ;;  %v1260_v55 = vpop.f32.mrb[2].mxu0  ;;  %v1308_v56 = vpop.f32.mrb[2].mxu1 }
 0x105   : > { %v1261_v57 = vpop.f32.mrb[3].mxu0  ;;  %v1309_v58 = vpop.f32.mrb[3].mxu1 }
 0x106   : > { %v583_v59 = vadd.f32 %v1259_v53, %v1737_v50  ;;  %v647_v60 = vadd.f32 %v1307_v54, %v1737_v50  ;;  %v1262_v61 = vadd.f32 %v1261_v57, %v1260_v55  ;;  %v1310_v62 = vadd.f32 %v1309_v58, %v1308_v56 }
 0x108   : > { %v586_v63 = vadd.f32 %v1262_v61, %v1737_v50  ;;  %v650_v0 = vadd.f32 %v1310_v62, %v1737_v50  ;;  %v709_v1 = vmax.f32 %v583_v59, 0.0  ;;  %v725_v2 = vmax.f32 %v647_v60, 0.0 }
 0x10a   : > { %v710_v3 = vmax.f32 %v586_v63, 0.0  ;;  %v726_v4 = vmax.f32 %v650_v0, 0.0  ;;  %v1263_v5 = vpop.f32.mrb[4].mxu0  ;;  %v1311_v6 = vpop.f32.mrb[4].mxu1 }
 0x10b   : > { %v1264_v7 = vpop.f32.mrb[5].mxu0  ;;  %v1312_v8 = vpop.f32.mrb[5].mxu1 }
 0x10c   : > { %v1149_v9 = vpack.c.bf16 %v710_v3, %v709_v1  ;;  %v1189_v10 = vpack.c.bf16 %v726_v4, %v725_v2  ;;  %v1265_v11 = vadd.f32 %v1264_v7, %v1263_v5  ;;  %v1313_v12 = vadd.f32 %v1312_v8, %v1311_v6  ;;  %v1266_v13 = vpop.f32.mrb[6].mxu0  ;;  %v1314_v14 = vpop.f32.mrb[6].mxu1 }
 0x10d   : > { %v1267_v15 = vpop.f32.mrb[7].mxu0  ;;  %v1315_v16 = vpop.f32.mrb[7].mxu1 }
 0x10e   : > { %1150 = vst [vmem:[%s1746_s7] sm:$0xff] %v1149_v9   ;;  %1233 = vst [vmem:[%s1746_s7 + $0x40] sm:$0xff] %v1189_v10   ;;  %v591_v17 = vadd.f32 %v1265_v11, %v1737_v50  ;;  %v655_v18 = vadd.f32 %v1313_v12, %v1737_v50  ;;  %v1268_v19 = vadd.f32 %v1267_v15, %v1266_v13 }
 0x10f   : > { %v1316_v20 = vadd.f32 %v1315_v16, %v1314_v14 }
 0x110   : > { %v594_v21 = vadd.f32 %v1268_v19, %v1737_v50  ;;  %v711_v23 = vmax.f32 %v591_v17, 0.0  ;;  %v727_v24 = vmax.f32 %v655_v18, 0.0 }
 0x111   : > { %v658_v22 = vadd.f32 %v1316_v20, %v1737_v50 }
 0x112   : > { %v712_v25 = vmax.f32 %v594_v21, 0.0  ;;  %v1269_v27 = vpop.f32.mrb[8].mxu0  ;;  %v1317_v28 = vpop.f32.mrb[8].mxu1 }
 0x113   : > { %v728_v26 = vmax.f32 %v658_v22, 0.0  ;;  %v1270_v29 = vpop.f32.mrb[9].mxu0  ;;  %v1318_v30 = vpop.f32.mrb[9].mxu1 }
 0x114   : > { %v1154_v31 = vpack.c.bf16 %v712_v25, %v711_v23  ;;  %v1271_v33 = vadd.f32 %v1270_v29, %v1269_v27  ;;  %v1319_v34 = vadd.f32 %v1318_v30, %v1317_v28  ;;  %v1272_v35 = vpop.f32.mrb[10].mxu0  ;;  %v1320_v36 = vpop.f32.mrb[10].mxu1 }
 0x115   : > { %v1194_v32 = vpack.c.bf16 %v728_v26, %v727_v24  ;;  %v1273_v37 = vpop.f32.mrb[11].mxu0  ;;  %v1321_v38 = vpop.f32.mrb[11].mxu1 }
 0x116   : > { %1226 = vst [vmem:[%s1746_s7 + $0x8] sm:$0xff] %v1154_v31   ;;  %v599_v39 = vadd.f32 %v1271_v33, %v1737_v50  ;;  %v663_v40 = vadd.f32 %v1319_v34, %v1737_v50  ;;  %v1274_v41 = vadd.f32 %v1273_v37, %v1272_v35  ;;  %v1322_v42 = vadd.f32 %v1321_v38, %v1320_v36 }
 0x117   : > { %1234 = vst [vmem:[%s1746_s7 + $0x48] sm:$0xff] %v1194_v32  }
 0x118   : > { %v602_v43 = vadd.f32 %v1274_v41, %v1737_v50  ;;  %v666_v44 = vadd.f32 %v1322_v42, %v1737_v50  ;;  %v713_v45 = vmax.f32 %v599_v39, 0.0  ;;  %v729_v46 = vmax.f32 %v663_v40, 0.0 }
 0x11a   : > { %v714_v47 = vmax.f32 %v602_v43, 0.0  ;;  %v730_v48 = vmax.f32 %v666_v44, 0.0  ;;  %v1275_v49 = vpop.f32.mrb[12].mxu0  ;;  %v1323_v51 = vpop.f32.mrb[12].mxu1 }
 0x11b   : > { %v1276_v52 = vpop.f32.mrb[13].mxu0  ;;  %v1324_v53 = vpop.f32.mrb[13].mxu1 }
 0x11c   : > { %v1159_v54 = vpack.c.bf16 %v714_v47, %v713_v45  ;;  %v1199_v55 = vpack.c.bf16 %v730_v48, %v729_v46  ;;  %v1277_v56 = vadd.f32 %v1276_v52, %v1275_v49  ;;  %v1325_v57 = vadd.f32 %v1324_v53, %v1323_v51  ;;  %v1278_v58 = vpop.f32.mrb[14].mxu0  ;;  %v1326_v59 = vpop.f32.mrb[14].mxu1 }
 0x11d   : > { %v1279_v60 = vpop.f32.mrb[15].mxu0  ;;  %v1327_v61 = vpop.f32.mrb[15].mxu1 }
 0x11e   : > { %1227 = vst [vmem:[%s1746_s7 + $0x10] sm:$0xff] %v1159_v54   ;;  %1235 = vst [vmem:[%s1746_s7 + $0x50] sm:$0xff] %v1199_v55   ;;  %v607_v62 = vadd.f32 %v1277_v56, %v1737_v50  ;;  %v671_v63 = vadd.f32 %v1325_v57, %v1737_v50  ;;  %v1280_v0 = vadd.f32 %v1279_v60, %v1278_v58 }
 0x11f   : > { %v1328_v1 = vadd.f32 %v1327_v61, %v1326_v59 }
 0x120   : > { %v610_v2 = vadd.f32 %v1280_v0, %v1737_v50  ;;  %v715_v4 = vmax.f32 %v607_v62, 0.0  ;;  %v731_v5 = vmax.f32 %v671_v63, 0.0 }
 0x121   : > { %v674_v3 = vadd.f32 %v1328_v1, %v1737_v50 }
 0x122   : > { %v716_v6 = vmax.f32 %v610_v2, 0.0  ;;  %v1281_v8 = vpop.f32.mrb[16].mxu0  ;;  %v1329_v9 = vpop.f32.mrb[16].mxu1 }
 0x123   : > { %v732_v7 = vmax.f32 %v674_v3, 0.0  ;;  %v1282_v10 = vpop.f32.mrb[17].mxu0  ;;  %v1330_v11 = vpop.f32.mrb[17].mxu1 }
 0x124   : > { %v1164_v12 = vpack.c.bf16 %v716_v6, %v715_v4  ;;  %v1283_v14 = vadd.f32 %v1282_v10, %v1281_v8  ;;  %v1331_v15 = vadd.f32 %v1330_v11, %v1329_v9  ;;  %v1284_v16 = vpop.f32.mrb[18].mxu0  ;;  %v1332_v17 = vpop.f32.mrb[18].mxu1 }
 0x125   : > { %v1204_v13 = vpack.c.bf16 %v732_v7, %v731_v5  ;;  %v1285_v18 = vpop.f32.mrb[19].mxu0  ;;  %v1333_v19 = vpop.f32.mrb[19].mxu1 }
 0x126   : > { %1228 = vst [vmem:[%s1746_s7 + $0x18] sm:$0xff] %v1164_v12   ;;  %v615_v20 = vadd.f32 %v1283_v14, %v1737_v50  ;;  %v679_v21 = vadd.f32 %v1331_v15, %v1737_v50  ;;  %v1286_v22 = vadd.f32 %v1285_v18, %v1284_v16  ;;  %v1334_v23 = vadd.f32 %v1333_v19, %v1332_v17 }
 0x127   : > { %1236 = vst [vmem:[%s1746_s7 + $0x58] sm:$0xff] %v1204_v13  }
 0x128   : > { %v618_v24 = vadd.f32 %v1286_v22, %v1737_v50  ;;  %v682_v25 = vadd.f32 %v1334_v23, %v1737_v50  ;;  %v717_v26 = vmax.f32 %v615_v20, 0.0  ;;  %v733_v27 = vmax.f32 %v679_v21, 0.0 }
 0x12a   : > { %v718_v28 = vmax.f32 %v618_v24, 0.0  ;;  %v734_v29 = vmax.f32 %v682_v25, 0.0  ;;  %v1287_v30 = vpop.f32.mrb[20].mxu0  ;;  %v1335_v31 = vpop.f32.mrb[20].mxu1 }
 0x12b   : > { %v1288_v32 = vpop.f32.mrb[21].mxu0  ;;  %v1336_v33 = vpop.f32.mrb[21].mxu1 }
 0x12c   : > { %v1169_v34 = vpack.c.bf16 %v718_v28, %v717_v26  ;;  %v1209_v35 = vpack.c.bf16 %v734_v29, %v733_v27  ;;  %v1289_v36 = vadd.f32 %v1288_v32, %v1287_v30  ;;  %v1337_v37 = vadd.f32 %v1336_v33, %v1335_v31  ;;  %v1290_v38 = vpop.f32.mrb[22].mxu0  ;;  %v1338_v39 = vpop.f32.mrb[22].mxu1 }
 0x12d   : > { %v1291_v40 = vpop.f32.mrb[23].mxu0  ;;  %v1339_v41 = vpop.f32.mrb[23].mxu1 }
 0x12e   : > { %1229 = vst [vmem:[%s1746_s7 + $0x20] sm:$0xff] %v1169_v34   ;;  %1237 = vst [vmem:[%s1746_s7 + $0x60] sm:$0xff] %v1209_v35   ;;  %v623_v42 = vadd.f32 %v1289_v36, %v1737_v50  ;;  %v687_v43 = vadd.f32 %v1337_v37, %v1737_v50  ;;  %v1292_v44 = vadd.f32 %v1291_v40, %v1290_v38 }
 0x12f   : > { %v1340_v45 = vadd.f32 %v1339_v41, %v1338_v39 }
 0x130   : > { %v626_v46 = vadd.f32 %v1292_v44, %v1737_v50  ;;  %v719_v48 = vmax.f32 %v623_v42, 0.0  ;;  %v735_v49 = vmax.f32 %v687_v43, 0.0 }
 0x131   : > { %v690_v47 = vadd.f32 %v1340_v45, %v1737_v50 }
 0x132   : > { %v720_v51 = vmax.f32 %v626_v46, 0.0  ;;  %v1293_v53 = vpop.f32.mrb[24].mxu0  ;;  %v1341_v54 = vpop.f32.mrb[24].mxu1 }
 0x133   : > { %v736_v52 = vmax.f32 %v690_v47, 0.0  ;;  %v1294_v55 = vpop.f32.mrb[25].mxu0  ;;  %v1342_v56 = vpop.f32.mrb[25].mxu1 }
 0x134   : > { %v1174_v57 = vpack.c.bf16 %v720_v51, %v719_v48  ;;  %v1295_v59 = vadd.f32 %v1294_v55, %v1293_v53  ;;  %v1343_v60 = vadd.f32 %v1342_v56, %v1341_v54  ;;  %v1296_v61 = vpop.f32.mrb[26].mxu0  ;;  %v1344_v62 = vpop.f32.mrb[26].mxu1 }
 0x135   : > { %v1214_v58 = vpack.c.bf16 %v736_v52, %v735_v49  ;;  %v1297_v63 = vpop.f32.mrb[27].mxu0  ;;  %v1345_v0 = vpop.f32.mrb[27].mxu1 }
 0x136   : > { %1230 = vst [vmem:[%s1746_s7 + $0x28] sm:$0xff] %v1174_v57   ;;  %v631_v1 = vadd.f32 %v1295_v59, %v1737_v50  ;;  %v695_v2 = vadd.f32 %v1343_v60, %v1737_v50  ;;  %v1298_v3 = vadd.f32 %v1297_v63, %v1296_v61  ;;  %v1346_v4 = vadd.f32 %v1345_v0, %v1344_v62 }
 0x137   : > { %1238 = vst [vmem:[%s1746_s7 + $0x68] sm:$0xff] %v1214_v58  }
 0x138   : > { %v634_v5 = vadd.f32 %v1298_v3, %v1737_v50  ;;  %v698_v6 = vadd.f32 %v1346_v4, %v1737_v50  ;;  %v721_v7 = vmax.f32 %v631_v1, 0.0  ;;  %v737_v8 = vmax.f32 %v695_v2, 0.0 }
 0x13a   : > { %v722_v9 = vmax.f32 %v634_v5, 0.0  ;;  %v738_v10 = vmax.f32 %v698_v6, 0.0  ;;  %v1299_v11 = vpop.f32.mrb[28].mxu0  ;;  %v1347_v12 = vpop.f32.mrb[28].mxu1 }
 0x13b   : > { %v1300_v13 = vpop.f32.mrb[29].mxu0  ;;  %v1348_v14 = vpop.f32.mrb[29].mxu1 }
 0x13c   : > { %v1179_v15 = vpack.c.bf16 %v722_v9, %v721_v7  ;;  %v1219_v16 = vpack.c.bf16 %v738_v10, %v737_v8  ;;  %v1301_v17 = vadd.f32 %v1300_v13, %v1299_v11  ;;  %v1349_v18 = vadd.f32 %v1348_v14, %v1347_v12  ;;  %v1302_v19 = vpop.f32.mrb[30].mxu0  ;;  %v1350_v20 = vpop.f32.mrb[30].mxu1 }
 0x13d   : > { %v1303_v21 = vpop.f32.mrb[31].mxu0  ;;  %v1351_v22 = vpop.f32.mrb[31].mxu1 }
 0x13e   : > { %1231 = vst [vmem:[%s1746_s7 + $0x30] sm:$0xff] %v1179_v15   ;;  %1239 = vst [vmem:[%s1746_s7 + $0x70] sm:$0xff] %v1219_v16   ;;  %v639_v23 = vadd.f32 %v1301_v17, %v1737_v50  ;;  %v703_v24 = vadd.f32 %v1349_v18, %v1737_v50  ;;  %v1304_v25 = vadd.f32 %v1303_v21, %v1302_v19 }
 0x13f   : > { %v1352_v26 = vadd.f32 %v1351_v22, %v1350_v20 }
 0x140   : > { %v642_v27 = vadd.f32 %v1304_v25, %v1737_v50  ;;  %v723_v29 = vmax.f32 %v639_v23, 0.0  ;;  %v739_v30 = vmax.f32 %v703_v24, 0.0 }
 0x141   : > { %v706_v28 = vadd.f32 %v1352_v26, %v1737_v50 }
 0x142   : > { %v724_v31 = vmax.f32 %v642_v27, 0.0 }
 0x143   : > { %v740_v32 = vmax.f32 %v706_v28, 0.0 }
 0x144   : > { %v1184_v33 = vpack.c.bf16 %v724_v31, %v723_v29 }
 0x145   : > { %v1224_v34 = vpack.c.bf16 %v740_v32, %v739_v30 }
 0x146   : > { %1232 = vst [vmem:[%s1746_s7 + $0x38] sm:$0xff] %v1184_v33  }
 0x147   : > { %1240 = vst [vmem:[%s1746_s7 + $0x78] sm:$0xff] %v1224_v34  }
 0x148   : > { %1503 = shalt.err (!%p1500_p5)
}
 0x149   : > { %s1504_s26 = scalar_lea.hbm %s1795_s11, 2048  ;;  %s1508_s30 = scalar_lea.hbm %s1852_s3, 4096 }
 0x14a   : > { %p1505_p6 = scmp.ne.s32.totalorder %s1795_s11, %s1504_s26  ;;  %p1509_p10 = scmp.lt.u32.totalorder %s1795_s11, %s1852_s3 }
 0x14b   : > { %p1510_p11 = scmp.lt.u32.totalorder %s1508_s30, %s1504_s26  ;;  %p1512_p13 = scmp.lt.u32.totalorder %s1504_s26, %s1795_s11 }
 0x14c   : > { %p1506_p7 = pnand %p1505_p6, %p1633_p4 }
 0x14d   : > { %p1511_p12 = por %p1510_p11, %p1509_p10 }
 0x14e   : > { %p1507_p9 = pneg %p1506_p7 }
 0x14f   : > { %p1513_p0 = por %p1512_p13, %p1511_p12 }
 0x151   : > { %p1514_p1 = pnand %p1513_p0, %p1507_p9 }
 0x153   : > { %1517 = shalt.err (!%p1514_p1)
}
 0x154   : > { %s1571_s5 = smov 64   ;;  %s1572_s7 = smov 4  }
 0x155   : > { %1369 = dma.vmem_to_hbm [thread:$0]  (%p1633_p4), %s1797_s8, 2048, %s1795_s11, %s1803_s15, %s1571_s5, %s1571_s5, %s1572_s7  }
 0x156 PF: > { %p1375_p2 = scmp.ge.s32.totalorder %s1568_s17, 2  ;;  %s931_s28 = sand.u32 1, %s1548_s12  }
 0x157   : > { %s932_s9 = scalar_lea.sflag [#allocation3], %s931_s28 }
 0x158   : > { %p1372_p3 = pnand %p1375_p2, %p1640_p8 }
 0x15a   : > { %1543 = dma.done.wait (!%p1372_p3), %s932_s9, 2048  }
 0x15b   : > { %1545 = vsyncadd (!%p1372_p3), %s932_s9, 4294965248  ;;  %s16_s17 = sadd.s32 1, %s1568_s17   ;;  %s1855_s12 = smov %s1552_s13 }
 0x15c   : > { %p13_p5 = scmp.ge.s32.totalorder %s16_s17, 4   ;;  %s1856_s13 = smov %s1556_s14 }
 0x15d   : > { %s1857_s14 = smov %s1646_s25  ;;  %s1858_s15 = smov %s1564_s16 }
 0x15e   : > { %s1859_s16 = smov %s1861_s20  ;;  %15 = sbr.rel (!%p13_p5) target bundleno = 4 (0x4), region = 73 }
 0x165   :  { %937 = vsyncpa [#allocation3], 1 }
 0x166   :  { %939 = vsyncpa [#allocation3 + $0x1], 1 }

</bundles_post_ra>
